<compile_context>
chip_gen: v6e
topology: v6e:2x2x1
jax: 0.10.0
libtpu: 0.0.40
codegen_flags: <defaults>
</compile_context>

<pallas_src>
import functools

import jax
import jax.numpy as jnp
from jax import lax
from jax.experimental import pallas as pl
from jax.experimental.pallas import tpu as pltpu


def _round_up(x, m):
    return (x + m - 1) // m * m


def _double_ds_conv_kernel(x_ref, w1_ref, sh1_ref, w2_ref, sh2_ref, o_ref, *, H, W):
    HW = H * W
    f32 = jnp.float32

    # ---- 3x3 edge-validity masks on the flattened spatial axis (built once,
    #      shared by both stages) --------------------------------------------
    pos = lax.broadcasted_iota(jnp.int32, (1, HW), 1)
    col = pos % W
    row_ok = (pos >= W, None, pos < (H - 1) * W)      # dh = 0, 1, 2
    col_ok = (col >= 1, None, col <= W - 2)           # dw = 0, 1, 2
    masks = []
    for dh in range(3):
        for dw in range(3):
            m = row_ok[dh]
            if col_ok[dw] is not None:
                m = col_ok[dw] if m is None else (m & col_ok[dw])
            masks.append(m)

    def taps9(a):
        """a: (C, HW) lane-dense -> (9*C, HW) stacked shifted taps, k = t*C + c."""
        pieces = []
        for dh in range(3):
            for dw in range(3):
                t = dh * 3 + dw
                s = (dh - 1) * W + (dw - 1)           # flat-axis source offset
                v = a if s == 0 else pltpu.roll(a, (-s) % HW, axis=1)
                if masks[t] is not None:
                    v = jnp.where(masks[t], v, 0.0)
                pieces.append(v)
        return jnp.concatenate(pieces, axis=0)

    # ---- stage 1: DW3x3 + PW1x1 + bias + BN folded into one MXU matmul ------
    x = x_ref[0].astype(f32)                                        # (Cin_p, HW)
    h1 = jnp.maximum(
        jnp.dot(w1_ref[...], taps9(x), preferred_element_type=f32)
        + sh1_ref[...],
        0.0)                                                        # (Cout_p, HW)

    # ---- stage 2: identical; h1 never leaves VMEM/vregs ----------------------
    y = jnp.maximum(
        jnp.dot(w2_ref[...], taps9(h1), preferred_element_type=f32)
        + sh2_ref[...],
        0.0)                                                        # (Cout_p, HW)
    o_ref[0] = y.astype(o_ref.dtype)


def _fold_stage(dw_w, dw_b, pw_w, pw_b, gamma, beta, mean, var,
                cin_p, cout_p, eps=1e-5):
    """Fold DW weight, both conv biases and eval-mode BN into one
    (Cout_p, 9*Cin_p) matmul weight and a (Cout_p, 1) per-channel shift.
    Tap order t = kh*3 + kw; contraction index k = t*Cin_p + ci."""
    cin = dw_w.shape[0]
    cout = pw_w.shape[0]
    dwk = dw_w.reshape(cin, 9).astype(jnp.float32)                  # (Cin, 9)
    pw = pw_w.reshape(cout, cin).astype(jnp.float32)                # (Cout, Cin)
    s = (gamma / jnp.sqrt(var + eps)).astype(jnp.float32)           # (Cout,)
    w_eff = jnp.einsum('oc,ct->otc', pw * s[:, None], dwk)          # (Cout, 9, Cin)
    w_eff = jnp.pad(w_eff, ((0, cout_p - cout), (0, 0), (0, cin_p - cin)))
    w_eff = w_eff.reshape(cout_p, 9 * cin_p).astype(jnp.float32)
    shift = s * (pw @ dw_b + pw_b) + (beta - s * mean)              # (Cout,)
    shift = jnp.pad(shift, (0, cout_p - cout)).reshape(cout_p, 1).astype(jnp.float32)
    return w_eff, shift


def double_ds_conv(x, params):
    (dw1_w, dw1_b, pw1_w, pw1_b, g1, b1, m1, v1,
     dw2_w, dw2_b, pw2_w, pw2_b, g2, b2, m2, v2) = params

    N, Cin, H, W = x.shape
    Cout = pw1_w.shape[0]
    HW = H * W
    # Sublane-align channel counts so the in-kernel tap stacking (concat along
    # the sublane axis) stays tile-aligned.  Padded channels carry zeros.
    Cin_p = _round_up(Cin, 8)
    Cout_p = _round_up(Cout, 8)

    w1, sh1 = _fold_stage(dw1_w, dw1_b, pw1_w, pw1_b, g1, b1, m1, v1, Cin_p, Cout_p)
    w2, sh2 = _fold_stage(dw2_w, dw2_b, pw2_w, pw2_b, g2, b2, m2, v2, Cout_p, Cout_p)

    # Lane-dense input: (N, Cin_p, H*W); the 3x3 halo is handled in-kernel with
    # rolls + edge masks (no spatial padding round-trip through HBM).
    x_flat = jnp.pad(x.reshape(N, Cin, HW), ((0, 0), (0, Cin_p - Cin), (0, 0)))

    kernel = functools.partial(_double_ds_conv_kernel, H=H, W=W)

    # Derived per-step VMEM footprint (f32 bytes): double-buffered I/O blocks,
    # (double-buffered) weights, tap stacks and live activations.
    est = 4 * (2 * (Cin_p + Cout_p) * HW
               + 2 * (9 * Cin_p * Cout_p + 9 * Cout_p * Cout_p + 2 * Cout_p)
               + (9 * Cin_p + 9 * Cout_p + 2 * Cout_p) * HW)
    vmem_limit = int(min(max(4 * est, 8 * 1024 * 1024), 48 * 1024 * 1024))

    out_flat = pl.pallas_call(
        kernel,
        out_shape=jax.ShapeDtypeStruct((N, Cout_p, HW), x.dtype),
        grid_spec=pltpu.PrefetchScalarGridSpec(
            num_scalar_prefetch=0,
            grid=(N,),
            in_specs=[
                pl.BlockSpec((1, Cin_p, HW), lambda n: (n, 0, 0)),
                pl.BlockSpec((Cout_p, 9 * Cin_p), lambda n: (0, 0)),
                pl.BlockSpec((Cout_p, 1), lambda n: (0, 0)),
                pl.BlockSpec((Cout_p, 9 * Cout_p), lambda n: (0, 0)),
                pl.BlockSpec((Cout_p, 1), lambda n: (0, 0)),
            ],
            out_specs=pl.BlockSpec((1, Cout_p, HW), lambda n: (n, 0, 0)),
        ),
        compiler_params=pltpu.CompilerParams(
            dimension_semantics=("parallel",),
            vmem_limit_bytes=vmem_limit,
        ),
    )(x_flat, w1, sh1, w2, sh2)

    return out_flat[:, :Cout, :].reshape(N, Cout, H, W)


# ---------------- pure-JAX reference (mirrors the PyTorch module) ----------------
def _ref_double_ds_conv(x, params):
    (dw1_w, dw1_b, pw1_w, pw1_b, g1, b1, m1, v1,
     dw2_w, dw2_b, pw2_w, pw2_b, g2, b2, m2, v2) = params

    def ds(x, dw_w, dw_b, pw_w, pw_b):
        y = lax.conv_general_dilated(
            x, dw_w, (1, 1), ((1, 1), (1, 1)),
            dimension_numbers=("NCHW", "OIHW", "NCHW"),
            feature_group_count=x.shape[1])
        y = y + dw_b[None, :, None, None]
        z = lax.conv_general_dilated(
            y, pw_w, (1, 1), ((0, 0), (0, 0)),
            dimension_numbers=("NCHW", "OIHW", "NCHW"))
        return z + pw_b[None, :, None, None]

    def bn_relu(x, g, b, m, v, eps=1e-5):
        s = g / jnp.sqrt(v + eps)
        return jnp.maximum(
            x * s[None, :, None, None] + (b - m * s)[None, :, None, None], 0.0)

    h = bn_relu(ds(x, dw1_w, dw1_b, pw1_w, pw1_b), g1, b1, m1, v1)
    return bn_relu(ds(h, dw2_w, dw2_b, pw2_w, pw2_b), g2, b2, m2, v2)


if __name__ == "__main__":
    N, Cin, Cout, H, W = 2, 4, 32, 16, 16
    f32 = jnp.float32
    key = jax.random.PRNGKey(0)
    keys = jax.random.split(key, 17)

    def nrm(k, shape, scale):
        return scale * jax.random.normal(k, shape, dtype=f32)

    x = jax.random.normal(keys[0], (N, Cin, H, W), dtype=f32)

    params = (
        # stage 1: DSConv(Cin -> Cout) + BN
        nrm(keys[1], (Cin, 1, 3, 3), 0.4), nrm(keys[2], (Cin,), 0.1),
        nrm(keys[3], (Cout, Cin, 1, 1), 0.5), nrm(keys[4], (Cout,), 0.1),
        1.0 + nrm(keys[5], (Cout,), 0.1), nrm(keys[6], (Cout,), 0.1),
        nrm(keys[7], (Cout,), 0.1),
        1.0 + 0.5 * jax.random.uniform(keys[8], (Cout,), dtype=f32),
        # stage 2: DSConv(Cout -> Cout) + BN
        nrm(keys[9], (Cout, 1, 3, 3), 0.2), nrm(keys[10], (Cout,), 0.1),
        nrm(keys[11], (Cout, Cout, 1, 1), 0.2), nrm(keys[12], (Cout,), 0.1),
        1.0 + nrm(keys[13], (Cout,), 0.1), nrm(keys[14], (Cout,), 0.1),
        nrm(keys[15], (Cout,), 0.1),
        1.0 + 0.5 * jax.random.uniform(keys[16], (Cout,), dtype=f32),
    )

    out = double_ds_conv(x, params)
    out = jax.block_until_ready(out)

    ref = _ref_double_ds_conv(x, params)
    assert out.shape == ref.shape, (out.shape, ref.shape)
    max_err = float(jnp.max(jnp.abs(out - ref)))
    assert jnp.allclose(out, ref, atol=2e-2, rtol=2e-2), f"max_err={max_err}"

    print("KERNEL_OK")
</pallas_src>

<mosaic_0001>
module attributes {stable_mosaic.version = 11 : i64} {
  func.func @_double_ds_conv_kernel(%arg0: i32, %arg1: memref<1x8x256xf32, #tpu.memory_space<vmem>>, %arg2: memref<32x72xf32, #tpu.memory_space<vmem>>, %arg3: memref<32x1xf32, #tpu.memory_space<vmem>>, %arg4: memref<32x288xf32, #tpu.memory_space<vmem>>, %arg5: memref<32x1xf32, #tpu.memory_space<vmem>>, %arg6: memref<1x32x256xf32, #tpu.memory_space<vmem>>) attributes {dimension_semantics = [#tpu.dimension_semantics<parallel>], iteration_bounds = array<i64: 2>, scalar_prefetch = 0 : i64, scratch_operands = 0 : i64, tpu.core_type = #tpu.core_type<tc>, window_params = [{transform_indices = @transform_0, window_bounds = array<i64: 1, 8, 256>}, {pipeline_mode = #tpu.pipeline_mode<synchronous>, transform_indices = @transform_1, window_bounds = array<i64: 32, 72>}, {pipeline_mode = #tpu.pipeline_mode<synchronous>, transform_indices = @transform_2, window_bounds = array<i64: 32, 1>}, {pipeline_mode = #tpu.pipeline_mode<synchronous>, transform_indices = @transform_3, window_bounds = array<i64: 32, 288>}, {pipeline_mode = #tpu.pipeline_mode<synchronous>, transform_indices = @transform_4, window_bounds = array<i64: 32, 1>}, {transform_indices = @transform_5, window_bounds = array<i64: 1, 32, 256>}]} {
    %0 = tpu.iota {dimensions = array<i32: 1>} : vector<1x256xi32>
    %c16_i32 = arith.constant 16 : i32
    %c0_i32 = arith.constant 0 : i32
    %1 = arith.cmpi eq, %c16_i32, %c0_i32 : i32
    %c1_i32 = arith.constant 1 : i32
    %2 = arith.select %1, %c1_i32, %c16_i32 : i32
    %3 = vector.broadcast %2 : i32 to vector<1x256xi32>
    %4 = arith.remsi %0, %3 : vector<1x256xi32>
    %c0_i32_0 = arith.constant 0 : i32
    %5 = vector.broadcast %c0_i32_0 : i32 to vector<1x256xi32>
    %6 = arith.cmpi ne, %4, %5 : vector<1x256xi32>
    %c0_i32_1 = arith.constant 0 : i32
    %7 = vector.broadcast %c0_i32_1 : i32 to vector<1x256xi32>
    %8 = arith.cmpi slt, %4, %7 : vector<1x256xi32>
    %c0_i32_2 = arith.constant 0 : i32
    %9 = arith.cmpi slt, %2, %c0_i32_2 : i32
    %10 = vector.broadcast %9 : i1 to vector<1x256xi1>
    %11 = vector.broadcast %10 : vector<1x256xi1> to vector<1x256xi1>
    %12 = arith.xori %8, %11 : vector<1x256xi1>
    %13 = arith.andi %12, %6 : vector<1x256xi1>
    %14 = vector.broadcast %2 : i32 to vector<1x256xi32>
    %15 = arith.addi %4, %14 : vector<1x256xi32>
    %16 = arith.select %13, %15, %4 : vector<1x256xi1>, vector<1x256xi32>
    %c16_i32_3 = arith.constant 16 : i32
    %17 = vector.broadcast %c16_i32_3 : i32 to vector<1x256xi32>
    %18 = arith.cmpi sge, %0, %17 : vector<1x256xi32>
    %c240_i32 = arith.constant 240 : i32
    %19 = vector.broadcast %c240_i32 : i32 to vector<1x256xi32>
    %20 = arith.cmpi slt, %0, %19 : vector<1x256xi32>
    %c1_i32_4 = arith.constant 1 : i32
    %21 = vector.broadcast %c1_i32_4 : i32 to vector<1x256xi32>
    %22 = arith.cmpi sge, %16, %21 : vector<1x256xi32>
    %c14_i32 = arith.constant 14 : i32
    %23 = vector.broadcast %c14_i32 : i32 to vector<1x256xi32>
    %24 = arith.cmpi sle, %16, %23 : vector<1x256xi32>
    %25 = arith.andi %18, %22 : vector<1x256xi1>
    %26 = arith.andi %18, %24 : vector<1x256xi1>
    %27 = arith.andi %20, %22 : vector<1x256xi1>
    %28 = arith.andi %20, %24 : vector<1x256xi1>
    %c0 = arith.constant 0 : index
    %c0_5 = arith.constant 0 : index
    %c0_6 = arith.constant 0 : index
    %29 = vector.load %arg1[%c0, %c0_5, %c0_6] : memref<1x8x256xf32, #tpu.memory_space<vmem>>, vector<1x8x256xf32>
    %30 = vector.shape_cast %29 : vector<1x8x256xf32> to vector<8x256xf32>
    %c0_7 = arith.constant 0 : index
    %c0_8 = arith.constant 0 : index
    %31 = vector.load %arg2[%c0_7, %c0_8] : memref<32x72xf32, #tpu.memory_space<vmem>>, vector<32x72xf32>
    %c17_i32 = arith.constant 17 : i32
    %32 = tpu.dynamic_rotate %30 by %c17_i32 dim 1 : vector<8x256xf32>, i32 -> vector<8x256xf32>
    %cst = arith.constant 0.000000e+00 : f32
    %33 = vector.shape_cast %25 : vector<1x256xi1> to vector<1x256xi1>
    %34 = vector.broadcast %33 : vector<1x256xi1> to vector<8x256xi1>
    %35 = vector.broadcast %cst : f32 to vector<8x256xf32>
    %36 = arith.select %34, %32, %35 : vector<8x256xi1>, vector<8x256xf32>
    %c16_i32_9 = arith.constant 16 : i32
    %37 = tpu.dynamic_rotate %30 by %c16_i32_9 dim 1 : vector<8x256xf32>, i32 -> vector<8x256xf32>
    %cst_10 = arith.constant 0.000000e+00 : f32
    %38 = vector.shape_cast %18 : vector<1x256xi1> to vector<1x256xi1>
    %39 = vector.broadcast %38 : vector<1x256xi1> to vector<8x256xi1>
    %40 = vector.broadcast %cst_10 : f32 to vector<8x256xf32>
    %41 = arith.select %39, %37, %40 : vector<8x256xi1>, vector<8x256xf32>
    %c15_i32 = arith.constant 15 : i32
    %42 = tpu.dynamic_rotate %30 by %c15_i32 dim 1 : vector<8x256xf32>, i32 -> vector<8x256xf32>
    %cst_11 = arith.constant 0.000000e+00 : f32
    %43 = vector.shape_cast %26 : vector<1x256xi1> to vector<1x256xi1>
    %44 = vector.broadcast %43 : vector<1x256xi1> to vector<8x256xi1>
    %45 = vector.broadcast %cst_11 : f32 to vector<8x256xf32>
    %46 = arith.select %44, %42, %45 : vector<8x256xi1>, vector<8x256xf32>
    %c1_i32_12 = arith.constant 1 : i32
    %47 = tpu.dynamic_rotate %30 by %c1_i32_12 dim 1 : vector<8x256xf32>, i32 -> vector<8x256xf32>
    %cst_13 = arith.constant 0.000000e+00 : f32
    %48 = vector.shape_cast %22 : vector<1x256xi1> to vector<1x256xi1>
    %49 = vector.broadcast %48 : vector<1x256xi1> to vector<8x256xi1>
    %50 = vector.broadcast %cst_13 : f32 to vector<8x256xf32>
    %51 = arith.select %49, %47, %50 : vector<8x256xi1>, vector<8x256xf32>
    %c255_i32 = arith.constant 255 : i32
    %52 = tpu.dynamic_rotate %30 by %c255_i32 dim 1 : vector<8x256xf32>, i32 -> vector<8x256xf32>
    %cst_14 = arith.constant 0.000000e+00 : f32
    %53 = vector.shape_cast %24 : vector<1x256xi1> to vector<1x256xi1>
    %54 = vector.broadcast %53 : vector<1x256xi1> to vector<8x256xi1>
    %55 = vector.broadcast %cst_14 : f32 to vector<8x256xf32>
    %56 = arith.select %54, %52, %55 : vector<8x256xi1>, vector<8x256xf32>
    %c241_i32 = arith.constant 241 : i32
    %57 = tpu.dynamic_rotate %30 by %c241_i32 dim 1 : vector<8x256xf32>, i32 -> vector<8x256xf32>
    %cst_15 = arith.constant 0.000000e+00 : f32
    %58 = vector.shape_cast %27 : vector<1x256xi1> to vector<1x256xi1>
    %59 = vector.broadcast %58 : vector<1x256xi1> to vector<8x256xi1>
    %60 = vector.broadcast %cst_15 : f32 to vector<8x256xf32>
    %61 = arith.select %59, %57, %60 : vector<8x256xi1>, vector<8x256xf32>
    %c240_i32_16 = arith.constant 240 : i32
    %62 = tpu.dynamic_rotate %30 by %c240_i32_16 dim 1 : vector<8x256xf32>, i32 -> vector<8x256xf32>
    %cst_17 = arith.constant 0.000000e+00 : f32
    %63 = vector.shape_cast %20 : vector<1x256xi1> to vector<1x256xi1>
    %64 = vector.broadcast %63 : vector<1x256xi1> to vector<8x256xi1>
    %65 = vector.broadcast %cst_17 : f32 to vector<8x256xf32>
    %66 = arith.select %64, %62, %65 : vector<8x256xi1>, vector<8x256xf32>
    %c239_i32 = arith.constant 239 : i32
    %67 = tpu.dynamic_rotate %30 by %c239_i32 dim 1 : vector<8x256xf32>, i32 -> vector<8x256xf32>
    %cst_18 = arith.constant 0.000000e+00 : f32
    %68 = vector.shape_cast %28 : vector<1x256xi1> to vector<1x256xi1>
    %69 = vector.broadcast %68 : vector<1x256xi1> to vector<8x256xi1>
    %70 = vector.broadcast %cst_18 : f32 to vector<8x256xf32>
    %71 = arith.select %69, %67, %70 : vector<8x256xi1>, vector<8x256xf32>
    %72 = tpu.concatenate %36, %41, %46, %51, %30, %56, %61, %66, %71 in 0 : vector<8x256xf32>, vector<8x256xf32>, vector<8x256xf32>, vector<8x256xf32>, vector<8x256xf32>, vector<8x256xf32>, vector<8x256xf32>, vector<8x256xf32>, vector<8x256xf32> -> vector<72x256xf32>
    %cst_19 = arith.constant dense<0.000000e+00> : vector<32x256xf32>
    %73 = tpu.matmul %31, %72, %cst_19 {dimension_numbers = #tpu.dot_dimension_numbers<[1], [0], [0], [1], [0, 0, 1, 1], [], []>} : vector<32x72xf32>, vector<72x256xf32>, vector<32x256xf32> -> vector<32x256xf32>
    %c0_20 = arith.constant 0 : index
    %c0_21 = arith.constant 0 : index
    %74 = vector.load %arg3[%c0_20, %c0_21] : memref<32x1xf32, #tpu.memory_space<vmem>>, vector<32x1xf32>
    %75 = vector.broadcast %74 : vector<32x1xf32> to vector<32x256xf32>
    %76 = arith.addf %73, %75 : vector<32x256xf32>
    %cst_22 = arith.constant 0.000000e+00 : f32
    %77 = vector.broadcast %cst_22 : f32 to vector<32x256xf32>
    %78 = arith.maximumf %76, %77 : vector<32x256xf32>
    %c0_23 = arith.constant 0 : index
    %c0_24 = arith.constant 0 : index
    %79 = vector.load %arg4[%c0_23, %c0_24] : memref<32x288xf32, #tpu.memory_space<vmem>>, vector<32x288xf32>
    %c17_i32_25 = arith.constant 17 : i32
    %80 = tpu.dynamic_rotate %78 by %c17_i32_25 dim 1 : vector<32x256xf32>, i32 -> vector<32x256xf32>
    %cst_26 = arith.constant 0.000000e+00 : f32
    %81 = vector.shape_cast %25 : vector<1x256xi1> to vector<1x256xi1>
    %82 = vector.broadcast %81 : vector<1x256xi1> to vector<32x256xi1>
    %83 = vector.broadcast %cst_26 : f32 to vector<32x256xf32>
    %84 = arith.select %82, %80, %83 : vector<32x256xi1>, vector<32x256xf32>
    %c16_i32_27 = arith.constant 16 : i32
    %85 = tpu.dynamic_rotate %78 by %c16_i32_27 dim 1 : vector<32x256xf32>, i32 -> vector<32x256xf32>
    %cst_28 = arith.constant 0.000000e+00 : f32
    %86 = vector.shape_cast %18 : vector<1x256xi1> to vector<1x256xi1>
    %87 = vector.broadcast %86 : vector<1x256xi1> to vector<32x256xi1>
    %88 = vector.broadcast %cst_28 : f32 to vector<32x256xf32>
    %89 = arith.select %87, %85, %88 : vector<32x256xi1>, vector<32x256xf32>
    %c15_i32_29 = arith.constant 15 : i32
    %90 = tpu.dynamic_rotate %78 by %c15_i32_29 dim 1 : vector<32x256xf32>, i32 -> vector<32x256xf32>
    %cst_30 = arith.constant 0.000000e+00 : f32
    %91 = vector.shape_cast %26 : vector<1x256xi1> to vector<1x256xi1>
    %92 = vector.broadcast %91 : vector<1x256xi1> to vector<32x256xi1>
    %93 = vector.broadcast %cst_30 : f32 to vector<32x256xf32>
    %94 = arith.select %92, %90, %93 : vector<32x256xi1>, vector<32x256xf32>
    %c1_i32_31 = arith.constant 1 : i32
    %95 = tpu.dynamic_rotate %78 by %c1_i32_31 dim 1 : vector<32x256xf32>, i32 -> vector<32x256xf32>
    %cst_32 = arith.constant 0.000000e+00 : f32
    %96 = vector.shape_cast %22 : vector<1x256xi1> to vector<1x256xi1>
    %97 = vector.broadcast %96 : vector<1x256xi1> to vector<32x256xi1>
    %98 = vector.broadcast %cst_32 : f32 to vector<32x256xf32>
    %99 = arith.select %97, %95, %98 : vector<32x256xi1>, vector<32x256xf32>
    %c255_i32_33 = arith.constant 255 : i32
    %100 = tpu.dynamic_rotate %78 by %c255_i32_33 dim 1 : vector<32x256xf32>, i32 -> vector<32x256xf32>
    %cst_34 = arith.constant 0.000000e+00 : f32
    %101 = vector.shape_cast %24 : vector<1x256xi1> to vector<1x256xi1>
    %102 = vector.broadcast %101 : vector<1x256xi1> to vector<32x256xi1>
    %103 = vector.broadcast %cst_34 : f32 to vector<32x256xf32>
    %104 = arith.select %102, %100, %103 : vector<32x256xi1>, vector<32x256xf32>
    %c241_i32_35 = arith.constant 241 : i32
    %105 = tpu.dynamic_rotate %78 by %c241_i32_35 dim 1 : vector<32x256xf32>, i32 -> vector<32x256xf32>
    %cst_36 = arith.constant 0.000000e+00 : f32
    %106 = vector.shape_cast %27 : vector<1x256xi1> to vector<1x256xi1>
    %107 = vector.broadcast %106 : vector<1x256xi1> to vector<32x256xi1>
    %108 = vector.broadcast %cst_36 : f32 to vector<32x256xf32>
    %109 = arith.select %107, %105, %108 : vector<32x256xi1>, vector<32x256xf32>
    %c240_i32_37 = arith.constant 240 : i32
    %110 = tpu.dynamic_rotate %78 by %c240_i32_37 dim 1 : vector<32x256xf32>, i32 -> vector<32x256xf32>
    %cst_38 = arith.constant 0.000000e+00 : f32
    %111 = vector.shape_cast %20 : vector<1x256xi1> to vector<1x256xi1>
    %112 = vector.broadcast %111 : vector<1x256xi1> to vector<32x256xi1>
    %113 = vector.broadcast %cst_38 : f32 to vector<32x256xf32>
    %114 = arith.select %112, %110, %113 : vector<32x256xi1>, vector<32x256xf32>
    %c239_i32_39 = arith.constant 239 : i32
    %115 = tpu.dynamic_rotate %78 by %c239_i32_39 dim 1 : vector<32x256xf32>, i32 -> vector<32x256xf32>
    %cst_40 = arith.constant 0.000000e+00 : f32
    %116 = vector.shape_cast %28 : vector<1x256xi1> to vector<1x256xi1>
    %117 = vector.broadcast %116 : vector<1x256xi1> to vector<32x256xi1>
    %118 = vector.broadcast %cst_40 : f32 to vector<32x256xf32>
    %119 = arith.select %117, %115, %118 : vector<32x256xi1>, vector<32x256xf32>
    %120 = tpu.concatenate %84, %89, %94, %99, %78, %104, %109, %114, %119 in 0 : vector<32x256xf32>, vector<32x256xf32>, vector<32x256xf32>, vector<32x256xf32>, vector<32x256xf32>, vector<32x256xf32>, vector<32x256xf32>, vector<32x256xf32>, vector<32x256xf32> -> vector<288x256xf32>
    %cst_41 = arith.constant dense<0.000000e+00> : vector<32x256xf32>
    %121 = tpu.matmul %79, %120, %cst_41 {dimension_numbers = #tpu.dot_dimension_numbers<[1], [0], [0], [1], [0, 0, 1, 1], [], []>} : vector<32x288xf32>, vector<288x256xf32>, vector<32x256xf32> -> vector<32x256xf32>
    %c0_42 = arith.constant 0 : index
    %c0_43 = arith.constant 0 : index
    %122 = vector.load %arg5[%c0_42, %c0_43] : memref<32x1xf32, #tpu.memory_space<vmem>>, vector<32x1xf32>
    %123 = vector.broadcast %122 : vector<32x1xf32> to vector<32x256xf32>
    %124 = arith.addf %121, %123 : vector<32x256xf32>
    %cst_44 = arith.constant 0.000000e+00 : f32
    %125 = vector.broadcast %cst_44 : f32 to vector<32x256xf32>
    %126 = arith.maximumf %124, %125 : vector<32x256xf32>
    %c0_45 = arith.constant 0 : index
    %c0_46 = arith.constant 0 : index
    %c0_47 = arith.constant 0 : index
    %127 = vector.load %arg6[%c0_45, %c0_46, %c0_47] : memref<1x32x256xf32, #tpu.memory_space<vmem>>, vector<1x32x256xf32>
    %128 = vector.shape_cast %127 : vector<1x32x256xf32> to vector<32x256xf32>
    %129 = vector.shape_cast %126 : vector<32x256xf32> to vector<1x32x256xf32>
    tpu.vector_store %arg6[%c0_45, %c0_46, %c0_47], %129 {strides = array<i32>} : memref<1x32x256xf32, #tpu.memory_space<vmem>>, vector<1x32x256xf32>,
    return
  }
  func.func @transform_0(%arg0: i32) -> (i32, i32, i32) {
    %c0_i32 = arith.constant 0 : i32
    %c0_i32_0 = arith.constant 0 : i32
    %c0_i32_1 = arith.constant 0 : i32
    return %arg0, %c0_i32, %c0_i32_0 : i32, i32, i32
  }
  func.func @transform_1(%arg0: i32) -> (i32, i32) {
    %c0_i32 = arith.constant 0 : i32
    %c0_i32_0 = arith.constant 0 : i32
    %c0_i32_1 = arith.constant 0 : i32
    return %c0_i32, %c0_i32_0 : i32, i32
  }
  func.func @transform_2(%arg0: i32) -> (i32, i32) {
    %c0_i32 = arith.constant 0 : i32
    %c0_i32_0 = arith.constant 0 : i32
    %c0_i32_1 = arith.constant 0 : i32
    return %c0_i32, %c0_i32_0 : i32, i32
  }
  func.func @transform_3(%arg0: i32) -> (i32, i32) {
    %c0_i32 = arith.constant 0 : i32
    %c0_i32_0 = arith.constant 0 : i32
    %c0_i32_1 = arith.constant 0 : i32
    return %c0_i32, %c0_i32_0 : i32, i32
  }
  func.func @transform_4(%arg0: i32) -> (i32, i32) {
    %c0_i32 = arith.constant 0 : i32
    %c0_i32_0 = arith.constant 0 : i32
    %c0_i32_1 = arith.constant 0 : i32
    return %c0_i32, %c0_i32_0 : i32, i32
  }
  func.func @transform_5(%arg0: i32) -> (i32, i32, i32) {
    %c0_i32 = arith.constant 0 : i32
    %c0_i32_0 = arith.constant 0 : i32
    %c0_i32_1 = arith.constant 0 : i32
    return %arg0, %c0_i32, %c0_i32_0 : i32, i32, i32
  }
}

</mosaic_0001>

<bundles_post_ra>
// kernel: tpu_custom_call.1
= control target key start
LH: loop header
LB: loop body
LE: loop exit
PB: predicated region body
PF: predicated region fallthrough
CT: control target
= control target key end

     0   :  { %10 = vsyncpa [#allocation3], 0  ;;  %s2233_s0 = inlined_call_operand.vmem [shape: f32[2,8,256], index: 0, kind: input, shape index: {}]   ;;  %s2234_s1 = inlined_call_operand.vmem [shape: f32[32,72], index: 1, kind: input, shape index: {}]   ;;  %s2235_s2 = inlined_call_operand.vmem [shape: f32[32,1], index: 2, kind: input, shape index: {}]   ;;  %s2236_s3 = inlined_call_operand.hbm [shape: f32[32,288], index: 3, kind: input, shape index: {}]   ;;  %s2237_s4 = inlined_call_operand.vmem [shape: f32[32,1], index: 4, kind: input, shape index: {}]   ;;  %s2238_s5 = inlined_call_operand.hbm [shape: f32[2,32,256], index: 5, kind: output, shape index: {}]  }
   0x1   :  { %11 = vsyncpa [#allocation4], 0 }
   0x2   :  { %13 = vsyncpa [#allocation4 + $0x1], 0  ;;  %s1408_s18 = smov 0   ;;  %s1410_s19 = smov 0  }
   0x3   :  { %s1412_s20 = smov 0   ;;  %s1414_s21 = smov 0  }
   0x4 LB: > { %s1429_s22 = sadd.s32 4294967295, %s1361_s21   ;;  %s1112_s23 = sadd.s32 4294967294, %s1361_s21   ;;  %s1361_s21 = sphi %s1414_s21, %s2289_s21   ;;  %s1357_s20 = sphi %s1412_s20, %s2288_s20   ;;  %s1353_s19 = sphi %s1410_s19, %s2287_s19   ;;  %s1349_s18 = sphi %s1408_s18, %s2286_s18  }
   0x5   : > { %s1433_s24 = sadd.s32 1, %s1361_s21   ;;  %s136_s25 = sadd.s32 1, %s1357_s20 }
   0x6   : > { %s133_s26 = ssub.s32 %s1361_s21, %s1433_s24  ;;  %p146_p0 = scmp.ne.s32.totalorder %s1357_s20, %s1353_s19 }
   0x7   : > { %p134_p1 = scmp.eq.s32.totalorder %s133_s26, 0  ;;  %p147_p2 = scmp.eq.s32.totalorder %s1429_s22, 1 }
   0x8   : > { %p152_p3 = scmp.ne.s32.totalorder %s1353_s19, %s1349_s18  ;;  %p153_p4 = scmp.eq.s32.totalorder %s1112_s23, 1 }
   0x9   : > { %s1444_s27 = scalar_select %p134_p1, %s1357_s20, %s136_s25  }
   0xa   : > { %p1446_p5 = por %p147_p2, %p146_p0  ;;  %p1450_p6 = por %p153_p4, %p152_p3 }
   0xb   : > { %p1113_p7 = scmp.ge.s32.totalorder %s1361_s21, 1  ;;  %p160_p8 = scmp.lt.s32.totalorder %s1361_s21, 3 }
   0xc   : > { %s2243_s29 = scalar_select %p1450_p6, 1, 0 }
   0xd   : > { %p1220_p9 = scmp.eq.s32.totalorder %s1429_s22, 0  ;;  %p1457_p10 = pnand %p1113_p7, %p160_p8 }
   0xe   : > { %s1363_s6 = smov [#allocation2]  }
   0xf   : > { %s178_s7 = sshll.u32 %s1363_s6, 4  ;;  %p1212_p11 = pneg %p1457_p10  ;;  %s179_s7 = int_to_ptr.vmem [resolvable:$true] %s178_s7 }
  0x10   : > { %s1282_s8 = scalar_lea.vmem %s179_s7, 1536  ;;  %p1290_p3 = scmp.lt.s32.totalorder %s179_s7, %s179_s7 }
  0x11   : > { %p1213_p12 = pnand %p1220_p9, %p1212_p11  ;;  %p1283_p0 = scmp.ne.s32.totalorder %s179_s7, %s1282_s8 }
  0x12   : > { %p1291_p4 = scmp.lt.s32.totalorder %s1282_s8, %s1282_s8 }
  0x13   : > { %p1273_p13 = pneg %p1213_p12 }
  0x14   : > { %p1292_p6 = por %p1291_p4, %p1290_p3 }
  0x15   : > { %p1285_p1 = pnand %p1283_p0, %p1273_p13 }
  0x17   : > { %p1286_p2 = pneg %p1285_p1 }
  0x19   : > { %p1293_p7 = pnand %p1292_p6, %p1286_p2 }
  0x1b   : > { %1296 = shalt.err (!%p1293_p7)
}
  0x1c   : > { %s1364_s9 = smov 384   ;;  %s1365_s10 = smov 24  }
  0x1d   : > { %1215 = dma.hbm_to_vmem [thread:$0]  (!%p1213_p12), %s2236_s3, 1536, %s179_s7, [#allocation3], %s1364_s9, %s1364_s9, %s1365_s10  }
  0x1e   : > { %205 = sbr.rel (%p1457_p10) target bundleno = 855 (0x357), region = 40 }
  0x23   : > { %1340 = dma.done.wait (%p1220_p9), [#allocation3], 1536  }
  0x24   : > { %1342 = vsyncadd (%p1220_p9), [#allocation3], 4294965760  ;;  %p233_p8 = scmp.lt.s32.totalorder %s1429_s22, 1  ;;  %s1366_s23 = smov 112   ;;  %v1371_v2 = vmov 0.0   ;;  %v394_v3 = vld [vmem:[%s2235_s2 + $0x18] sm:$0xff]  ;;  %v238_v8 = vlaneseq }
  0x25   : > { %s1367_s25 = smov 111   ;;  %s1368_s26 = smov 113   ;;  %492 = vmatprep.mubr.f32.mxu0 %v1371_v2  ;;  %v393_v4 = vld [vmem:[%s2235_s2 + $0x10] sm:$0xff]  ;;  %v1375_v5 = vmov 0   ;;  %v391_v6 = vld [vmem:[%s2235_s2] sm:$0xff]  ;;  %v392_v7 = vld [vmem:[%s2235_s2 + $0x8] sm:$0xff] }
  0x26   : > { %s234_s13 = scalar_select %p233_p8, %s1429_s22, 1  ;;  %1269 = vset.pattern.permute.xlu0 %v1375_v5  ;;  %1270 = vset.pattern.permute.xlu1 %v1375_v5  ;;  %v1528_v9 = vand.u32 127, %v238_v8  ;;  %v283_v53 = vld [vmem:[%s2234_s1] sm:$0xff]  ;;  %v284_v54 = vld [vmem:[%s2234_s1 + $0x8] sm:$0xff]  ;;  %v285_v55 = vld [vmem:[%s2234_s1 + $0x10] sm:$0xff] }
  0x27   : > { %s1369_s30 = smov 127   ;;  %s1370_s6 = smov 1   ;;  %v286_v56 = vld [vmem:[%s2234_s1 + $0x18] sm:$0xff]  ;;  %v535_v16 = vld [vmem:[#allocation2 + $0x50] sm:$0xff]  ;;  %v533_v20 = vld [vmem:[#allocation2 + $0x40] sm:$0xff] }
  0x28   : > { %s1204_s14 = sshll.u32 %s234_s13, 4  ;;  %s1372_s7 = smov 15   ;;  %v1531_v10 = vadd.s32 128, %v1528_v9  ;;  %v245_v15 = vand.u32 15, %v1528_v9  ;;  %vm2239_vm2 = vcmp.lt.s32.totalorder %v1528_v9, 111  ;;  %vm369_vm4 = vcmp.lt.s32.totalorder %v1528_v9, 112 }
  0x29   : > { %s237_s17 = scalar_lea.vmem %s2233_s0, %s1204_s14  ;;  %s1373_s8 = smov 16   ;;  %vm2241_vm7 = vcmp.lt.s32.totalorder %v1528_v9, 113  ;;  %vm2240_vm10 = vcmp.lt.s32.totalorder %v1528_v9, 127  ;;  %vm330_vm11 = vcmp.lt.s32.totalorder %v1528_v9, 1  ;;  %vm265_vm12 = vcmp.ge.s32.totalorder %v1528_v9, 16 }
  0x2a   : > { %v1479_v0 = vld [vmem:[%s237_s17] sm:$0xff]  ;;  %v1485_v1 = vld [vmem:[%s237_s17 + $0x8] sm:$0xff]  ;;  %s1374_s9 = smov 17   ;;  %v252_v11 = vand.u32 15, %v1531_v10  ;;  %vm268_vm0 = vcmp.lt.s32.totalorder %v1531_v10, 240  ;;  %vm1554_vm6 = vcmp.le.s32.totalorder %v245_v15, 14 }
  0x2b   : > { %365 = vrot.lane.b32.xlu1 %v1479_v0, %s1366_s23  ;;  %378 = vrot.lane.b32.xlu0 %v1479_v0, %s1367_s25  ;;  %vm1581_vm9 = vcmp.ge.s32.totalorder %v245_v15, 1  ;;  %vm317_vm13 = vcmp.lt.s32.totalorder %v1528_v9, 15  ;;  %vm1619_vm14 = vmand %vm265_vm12, %vm1554_vm6  ;;  %vm304_vm15 = vcmp.lt.s32.totalorder %v1528_v9, 16  ;;  %s230_s11 = sand.u32 1, %s1353_s19   ;;  %s1205_s15 = sshll.u32 %s1429_s22, 10 }
  0x2c   : > { %vm1535_vm1 = vcmp.le.s32.totalorder %v252_v11, 14  ;;  %vm1550_vm5 = vcmp.ge.s32.totalorder %v252_v11, 1  ;;  %s1118_s12 = sshll.u32 %s230_s11, 6 }
  0x2d   : > { %vm1545_vm3 = vmand %vm268_vm0, %vm1535_vm1  ;;  %s2171_s13 = scalar_lea.vmem [#allocation5], %s1118_s12 }
  0x2e   : > { %vm1573_vm8 = vmand %vm268_vm0, %vm1550_vm5  ;;  %s1038_s14 = sshll.u32 %s2171_s13, 4  ;;  %s2181_s14 = int_to_ptr.vmem [resolvable:$true] %s1038_s14 }
  0x2f   : > { %367 = vrot.lane.b32.xlu1 %v1485_v1, %s1366_s23  ;;  %380 = vrot.lane.b32.xlu0 %v1485_v1, %s1367_s25  ;;  %s1297_s22 = scalar_lea.vmem %s2181_s14, 1024 }
  0x30   : > { %p1298_p6 = scmp.ne.s32.totalorder %s2181_s14, %s1297_s22 }
  0x32   : > { %p1299_p9 = pnand %p1298_p6, %p1446_p5 }
  0x33   : > { %354 = vrot.lane.b32.xlu1 %v1485_v1, %s1368_s26  ;;  %352 = vrot.lane.b32.xlu0 %v1479_v0, %s1368_s26 }
  0x34   : > { %p1300_p10 = pneg %p1299_p9 }
  0x37   : > { %341 = vrot.lane.b32.xlu1 %v1485_v1, %s1369_s30  ;;  %339 = vrot.lane.b32.xlu0 %v1479_v0, %s1369_s30 }
  0x3b   : > { %328 = vrot.lane.b32.xlu1 %v1485_v1, %s1370_s6  ;;  %326 = vrot.lane.b32.xlu0 %v1479_v0, %s1370_s6 }
  0x3f   : > { %315 = vrot.lane.b32.xlu1 %v1485_v1, %s1372_s7  ;;  %313 = vrot.lane.b32.xlu0 %v1479_v0, %s1372_s7 }
  0x43   : > { %302 = vrot.lane.b32.xlu1 %v1485_v1, %s1373_s8  ;;  %300 = vrot.lane.b32.xlu0 %v1479_v0, %s1373_s8 }
  0x47   : > { %289 = vrot.lane.b32.xlu1 %v1485_v1, %s1374_s9  ;;  %287 = vrot.lane.b32.xlu0 %v1479_v0, %s1374_s9 }
  0x4b   : > { %412 = vperm.xlu0 %1269, %v394_v3   ;;  %407 = vperm.xlu1 %1270, %v393_v4  }
  0x4f   : > { %397 = vperm.xlu0 %1269, %v391_v6   ;;  %402 = vperm.xlu1 %1270, %v392_v7  }
  0x9d   : > { %v366_v12 = vpop.permute.xlu1 %365  ;;  %v379_v13 = vpop.permute.xlu0 %378 }
  0xa1   : > { %v368_v17 = vpop.permute.xlu1 %367  ;;  %v381_v18 = vpop.permute.xlu0 %380 }
  0xa2   : > { %v384_v21 = vsel %vm2239_vm2, %v381_v18, %v379_v13  ;;  %v383_v22 = vsel %vm2239_vm2, %v379_v13, %v381_v18  ;;  %v371_v23 = vsel %vm369_vm4, %v368_v17, %v366_v12  ;;  %v370_v27 = vsel %vm369_vm4, %v366_v12, %v368_v17 }
  0xa3   : > { %1121 = vmatprep.subr.msk.mxu0 %vm1545_vm3, %v384_v21  ;;  %vm291_vm2 = vcmp.lt.s32.totalorder %v1528_v9, 17 }
  0xa4   : > { %1122 = vmatpush1.msk.msra.mxu0 %vm1554_vm6, %v383_v22 }
  0xa5   : > { %v355_v25 = vpop.permute.xlu1 %354  ;;  %1123 = vmatprep.subr.msk.mxu0 %vm268_vm0, %v371_v23  ;;  %v353_v26 = vpop.permute.xlu0 %352 }
  0xa6   : > { %v357_v29 = vsel %vm2241_vm7, %v353_v26, %v355_v25  ;;  %v358_v30 = vsel %vm2241_vm7, %v355_v25, %v353_v26  ;;  %445 = vmatpush1.msra.mxu0 %v370_v27  ;;  %vm415_vm7 = vcmask 588800  }
  0xa7   : > { %1124 = vmatprep.subr.msk.mxu0 %vm1573_vm8, %v358_v30  ;;  %v526_v30 = vld [vmem:[#allocation2 + $0x8] sm:$0xff] }
  0xa8   : > { %1125 = vmatpush1.msk.msra.mxu0 %vm1581_vm9, %v357_v29  ;;  %894 = vmatprep.mubr.f32.mxu1 %v526_v30 }
  0xa9   : > { %v342_v31 = vpop.permute.xlu1 %341  ;;  %v340_v32 = vpop.permute.xlu0 %339 }
  0xaa   : > { %v344_v33 = vsel %vm2240_vm10, %v340_v32, %v342_v31  ;;  %v345_v34 = vsel %vm2240_vm10, %v342_v31, %v340_v32  ;;  %vm1643_vm10 = vmand %vm265_vm12, %vm1581_vm9 }
  0xab   : > { %1126 = vmatprep.subr.msk.mxu0 %vm1535_vm1, %v345_v34 }
  0xac   : > { %1127 = vmatpush1.msk.msra.mxu0 %vm1554_vm6, %v344_v33 }
  0xad   : > { %v329_v35 = vpop.permute.xlu1 %328  ;;  %450 = vmatprep.subr.mxu0 %v1485_v1  ;;  %v327_v36 = vpop.permute.xlu0 %326 }
  0xae   : > { %v331_v37 = vsel %vm330_vm11, %v327_v36, %v329_v35  ;;  %v332_v38 = vsel %vm330_vm11, %v329_v35, %v327_v36  ;;  %451 = vmatpush1.msra.mxu0 %v1479_v0 }
  0xaf   : > { %1128 = vmatprep.subr.msk.mxu0 %vm1550_vm5, %v331_v37 }
  0xb0   : > { %1129 = vmatpush1.msk.msra.mxu0 %vm1581_vm9, %v332_v38 }
  0xb1   : > { %v316_v39 = vpop.permute.xlu1 %315  ;;  %v314_v40 = vpop.permute.xlu0 %313 }
  0xb2   : > { %v318_v42 = vsel %vm317_vm13, %v314_v40, %v316_v39  ;;  %v319_v43 = vsel %vm317_vm13, %v316_v39, %v314_v40 }
  0xb3   : > { %1130 = vmatprep.subr.msk.mxu0 %vm1535_vm1, %v318_v42 }
  0xb4   : > { %1131 = vmatpush1.msk.msra.mxu0 %vm1619_vm14, %v319_v43  ;;  %v793_v43 = vld [vmem:[%s2237_s4] sm:$0xff] }
  0xb5   : > { %v303_v44 = vpop.permute.xlu1 %302  ;;  %v301_v45 = vpop.permute.xlu0 %300 }
  0xb6   : > { %v306_v46 = vsel %vm304_vm15, %v303_v44, %v301_v45  ;;  %v305_v47 = vsel %vm304_vm15, %v301_v45, %v303_v44 }
  0xb7   : > { %456 = vmatprep.subr.mxu0 %v305_v47 }
  0xb8   : > { %1132 = vmatpush1.msk.msra.mxu0 %vm265_vm12, %v306_v46  ;;  %v794_v46 = vld [vmem:[%s2237_s4 + $0x8] sm:$0xff] }
  0xb9   : > { %v290_v48 = vpop.permute.xlu1 %289  ;;  %v288_v49 = vpop.permute.xlu0 %287 }
  0xba   : > { %v292_v51 = vsel %vm291_vm2, %v288_v49, %v290_v48  ;;  %v293_v52 = vsel %vm291_vm2, %v290_v48, %v288_v49 }
  0xbb   : > { %1133 = vmatprep.subr.msk.mxu0 %vm1550_vm5, %v292_v51  ;;  %v795_v51 = vld [vmem:[%s2237_s4 + $0x10] sm:$0xff] }
  0xbc   : > { %1134 = vmatpush1.msk.msra.mxu0 %vm1643_vm10, %v293_v52 }
  0xbd   : > { %1135 = vmatmul.mubr.msk.f32.vlgmr.msra.gmra.mxu0 %vm415_vm7, %v283_v53  ;;  %v796_v53 = vld [vmem:[%s2237_s4 + $0x18] sm:$0xff] }
  0xbe   : > { %498 = vmatprep.mubr.f32.mxu0 %v1371_v2 }
  0xc1   : > { %1136 = vmatmul.mubr.msk.f32.gmra.mxu0 %vm415_vm7, %v284_v54 }
  0xc2   : > { %504 = vmatprep.mubr.f32.mxu0 %v1371_v2 }
  0xc5   : > { %1137 = vmatmul.mubr.msk.f32.gmra.mxu0 %vm415_vm7, %v285_v55 }
  0xc6   : > { %510 = vmatprep.mubr.f32.mxu0 %v1371_v2  ;;  %v413_v57 = vpop.permute.xlu0 %412  ;;  %v408_v1 = vpop.permute.xlu1 %407 }
  0xc9   : > { %1138 = vmatmul.mubr.msk.f32.gmra.mxu0 %vm415_vm7, %v286_v56 }
  0xca   : > { %983 = vmatprep.mubr.f32.mxu0 %v1371_v2  ;;  %v398_v58 = vpop.permute.xlu0 %397  ;;  %v403_v4 = vpop.permute.xlu1 %402 }
 0x17d   : > { %v494_v59 = vpop.f32.mrf.mxu0 }
 0x17e   : > { %v495_v60 = vadd.f32 %v494_v59, %v398_v58 }
 0x17f   : > { %v496_v61 = vpop.f32.mrf.mxu0 }
 0x180   : > { %v1671_v62 = vmax.f32 %v495_v60, 0.0  ;;  %v497_v63 = vadd.f32 %v496_v61, %v398_v58 }
 0x181   : > { %v500_v3 = vpop.f32.mrf.mxu0 }
 0x182   : > { %v1673_v0 = vmax.f32 %v497_v63, 0.0  ;;  %633 = vrot.lane.b32.xlu1 %v1671_v62, %s1370_s6  ;;  %v501_v5 = vadd.f32 %v500_v3, %v403_v4 }
 0x183   : > { %v502_v6 = vpop.f32.mrf.mxu0 }
 0x184   : > { %641 = vrot.lane.b32.xlu0 %v1673_v0, %s1370_s6  ;;  %v503_v7 = vadd.f32 %v502_v6, %v403_v4  ;;  %v1693_v8 = vmax.f32 %v501_v5, 0.0 }
 0x185   : > { %v506_v12 = vpop.f32.mrf.mxu0 }
 0x186   : > { %601 = vrot.lane.b32.xlu1 %v1671_v62, %s1372_s7  ;;  %v1697_v11 = vmax.f32 %v503_v7, 0.0  ;;  %v507_v13 = vadd.f32 %v506_v12, %v408_v1 }
 0x187   : > { %v508_v15 = vpop.f32.mrf.mxu0 }
 0x188   : > { %609 = vrot.lane.b32.xlu0 %v1673_v0, %s1372_s7  ;;  %v509_v17 = vadd.f32 %v508_v15, %v408_v1  ;;  %v1717_v18 = vmax.f32 %v507_v13, 0.0 }
 0x189   : > { %v512_v22 = vpop.f32.mrf.mxu0 }
 0x18a   : > { %569 = vrot.lane.b32.xlu1 %v1671_v62, %s1373_s8  ;;  %v1721_v21 = vmax.f32 %v509_v17, 0.0  ;;  %v513_v25 = vadd.f32 %v512_v22, %v413_v57 }
 0x18b   : > { %v514_v23 = vpop.f32.mrf.mxu0 }
 0x18c   : > { %577 = vrot.lane.b32.xlu0 %v1673_v0, %s1373_s8  ;;  %v515_v26 = vadd.f32 %v514_v23, %v413_v57  ;;  %v1741_v27 = vmax.f32 %v513_v25, 0.0 }
 0x18e   : > { %537 = vrot.lane.b32.xlu1 %v1671_v62, %s1374_s9  ;;  %v1745_v29 = vmax.f32 %v515_v26, 0.0 }
 0x190   : > { %545 = vrot.lane.b32.xlu0 %v1673_v0, %s1374_s9 }
 0x192   : > { %729 = vrot.lane.b32.xlu1 %v1671_v62, %s1366_s23 }
 0x194   : > { %737 = vrot.lane.b32.xlu0 %v1673_v0, %s1366_s23 }
 0x196   : > { %635 = vrot.lane.b32.xlu1 %v1693_v8, %s1370_s6 }
 0x198   : > { %643 = vrot.lane.b32.xlu0 %v1697_v11, %s1370_s6 }
 0x19a   : > { %603 = vrot.lane.b32.xlu1 %v1693_v8, %s1372_s7 }
 0x19c   : > { %611 = vrot.lane.b32.xlu0 %v1697_v11, %s1372_s7 }
 0x19e   : > { %571 = vrot.lane.b32.xlu1 %v1693_v8, %s1373_s8 }
 0x1a0   : > { %579 = vrot.lane.b32.xlu0 %v1697_v11, %s1373_s8 }
 0x1a2   : > { %539 = vrot.lane.b32.xlu1 %v1693_v8, %s1374_s9 }
 0x1a4   : > { %547 = vrot.lane.b32.xlu0 %v1697_v11, %s1374_s9 }
 0x1a6   : > { %731 = vrot.lane.b32.xlu1 %v1693_v8, %s1366_s23 }
 0x1a8   : > { %739 = vrot.lane.b32.xlu0 %v1697_v11, %s1366_s23 }
 0x1aa   : > { %637 = vrot.lane.b32.xlu1 %v1717_v18, %s1370_s6 }
 0x1ac   : > { %645 = vrot.lane.b32.xlu0 %v1721_v21, %s1370_s6 }
 0x1ae   : > { %605 = vrot.lane.b32.xlu1 %v1717_v18, %s1372_s7 }
 0x1b0   : > { %613 = vrot.lane.b32.xlu0 %v1721_v21, %s1372_s7 }
 0x1b2   : > { %573 = vrot.lane.b32.xlu1 %v1717_v18, %s1373_s8 }
 0x1b4   : > { %581 = vrot.lane.b32.xlu0 %v1721_v21, %s1373_s8 }
 0x1b6   : > { %541 = vrot.lane.b32.xlu1 %v1717_v18, %s1374_s9 }
 0x1b8   : > { %549 = vrot.lane.b32.xlu0 %v1721_v21, %s1374_s9 }
 0x1ba   : > { %733 = vrot.lane.b32.xlu1 %v1717_v18, %s1366_s23 }
 0x1bc   : > { %741 = vrot.lane.b32.xlu0 %v1721_v21, %s1366_s23 }
 0x1be   : > { %639 = vrot.lane.b32.xlu1 %v1741_v27, %s1370_s6 }
 0x1c0   : > { %647 = vrot.lane.b32.xlu0 %v1745_v29, %s1370_s6 }
 0x1c2   : > { %701 = vrot.lane.b32.xlu1 %v1717_v18, %s1368_s26 }
 0x1c4   : > { %709 = vrot.lane.b32.xlu0 %v1721_v21, %s1368_s26 }
 0x1c6   : > { %607 = vrot.lane.b32.xlu1 %v1741_v27, %s1372_s7 }
 0x1c8   : > { %615 = vrot.lane.b32.xlu0 %v1745_v29, %s1372_s7 }
 0x1ca   : > { %575 = vrot.lane.b32.xlu1 %v1741_v27, %s1373_s8 }
 0x1cc   : > { %707 = vrot.lane.b32.xlu0 %v1697_v11, %s1368_s26 }
 0x1ce   : > { %543 = vrot.lane.b32.xlu1 %v1741_v27, %s1374_s9 }
 0x1d0   : > { %583 = vrot.lane.b32.xlu0 %v1745_v29, %s1373_s8 }
 0x1d2   : > { %735 = vrot.lane.b32.xlu1 %v1741_v27, %s1366_s23 }
 0x1d4   : > { %705 = vrot.lane.b32.xlu0 %v1673_v0, %s1368_s26 }
 0x1d6   : > { %703 = vrot.lane.b32.xlu1 %v1741_v27, %s1368_s26 }
 0x1d8   : > { %551 = vrot.lane.b32.xlu0 %v1745_v29, %s1374_s9 }
 0x1da   : > { %699 = vrot.lane.b32.xlu1 %v1693_v8, %s1368_s26 }
 0x1dc   : > { %677 = vrot.lane.b32.xlu0 %v1721_v21, %s1369_s30 }
 0x1de   : > { %697 = vrot.lane.b32.xlu1 %v1671_v62, %s1368_s26 }
 0x1e0   : > { %743 = vrot.lane.b32.xlu0 %v1745_v29, %s1366_s23  ;;  %s2187_s23 = scalar_lea.hbm %s2238_s5, %s1205_s15 }
 0x1e2   : > { %671 = vrot.lane.b32.xlu1 %v1741_v27, %s1369_s30 }
 0x1e4   : > { %675 = vrot.lane.b32.xlu0 %v1697_v11, %s1369_s30 }
 0x1e6   : > { %669 = vrot.lane.b32.xlu1 %v1717_v18, %s1369_s30 }
 0x1e8   : > { %711 = vrot.lane.b32.xlu0 %v1745_v29, %s1368_s26  ;;  %s2192_s26 = scalar_lea.sflag [#allocation4], %s230_s11 }
 0x1ea   : > { %667 = vrot.lane.b32.xlu1 %v1693_v8, %s1369_s30 }
 0x1ec   : > { %673 = vrot.lane.b32.xlu0 %v1673_v0, %s1369_s30 }
 0x1ee   : > { %665 = vrot.lane.b32.xlu1 %v1671_v62, %s1369_s30 }
 0x1f0   : > { %679 = vrot.lane.b32.xlu0 %v1745_v29, %s1369_s30  ;;  %s1376_s30 = smov [#allocation5]  }
 0x1f1   : > { %s1301_s6 = sshll.u32 %s1376_s30, 4  ;;  %s1302_s6 = int_to_ptr.vmem [resolvable:$false] %s1301_s6 }
 0x1f2   : > { %767 = vrot.lane.b32.xlu1 %v1741_v27, %s1367_s25  ;;  %s1303_s7 = scalar_lea.vmem %s1302_s6, 2048  ;;  %p1304_p11 = scmp.lt.s32.totalorder %s2181_s14, %s1302_s6 }
 0x1f3   : > { %p1305_p12 = scmp.lt.s32.totalorder %s1303_s7, %s1297_s22 }
 0x1f4   : > { %773 = vrot.lane.b32.xlu0 %v1721_v21, %s1367_s25  ;;  %v634_v31 = vpop.permute.xlu1 %633 }
 0x1f5   : > { %p1306_p13 = por %p1305_p12, %p1304_p11 }
 0x1f6   : > { %v642_v32 = vpop.permute.xlu0 %641  ;;  %765 = vrot.lane.b32.xlu1 %v1717_v18, %s1367_s25 }
 0x1f7   : > { %v1807_v33 = vsel %vm330_vm11, %v634_v31, %v642_v32  ;;  %v1811_v34 = vsel %vm330_vm11, %v642_v32, %v634_v31  ;;  %p1307_p0 = pnand %p1306_p13, %p1300_p10 }
 0x1f8   : > { %775 = vrot.lane.b32.xlu0 %v1745_v29, %s1367_s25  ;;  %v602_v35 = vpop.permute.xlu1 %601 }
 0x1fa   : > { %v610_v36 = vpop.permute.xlu0 %609  ;;  %763 = vrot.lane.b32.xlu1 %v1693_v8, %s1367_s25 }
 0x1fb   : > { %v1819_v37 = vsel %vm317_vm13, %v602_v35, %v610_v36  ;;  %v1823_v38 = vsel %vm317_vm13, %v610_v36, %v602_v35 }
 0x1fc   : > { %771 = vrot.lane.b32.xlu0 %v1697_v11, %s1367_s25  ;;  %v570_v39 = vpop.permute.xlu1 %569 }
 0x1fe   : > { %v578_v40 = vpop.permute.xlu0 %577  ;;  %761 = vrot.lane.b32.xlu1 %v1671_v62, %s1367_s25 }
 0x1ff   : > { %v1831_v42 = vsel %vm304_vm15, %v578_v40, %v570_v39  ;;  %v1838_v44 = vsel %vm304_vm15, %v570_v39, %v578_v40 }
 0x200   : > { %769 = vrot.lane.b32.xlu0 %v1673_v0, %s1367_s25  ;;  %v538_v45 = vpop.permute.xlu1 %537 }
 0x202   : > { %v546_v47 = vpop.permute.xlu0 %545  ;;  %799 = vperm.xlu1 %1270, %v793_v43  }
 0x203   : > { %v1847_v48 = vsel %vm291_vm2, %v538_v45, %v546_v47  ;;  %v1851_v49 = vsel %vm291_vm2, %v546_v47, %v538_v45 }
 0x204   : > { %804 = vperm.xlu0 %1269, %v794_v46   ;;  %v730_v52 = vpop.permute.xlu1 %729 }
 0x206   : > { %v738_v54 = vpop.permute.xlu0 %737  ;;  %809 = vperm.xlu1 %1270, %v795_v51  }
 0x207   : > { %v1861_v55 = vsel %vm369_vm4, %v738_v54, %v730_v52  ;;  %v1865_v56 = vsel %vm369_vm4, %v730_v52, %v738_v54 }
 0x208   : > { %814 = vperm.xlu0 %1269, %v796_v53   ;;  %v636_v57 = vpop.permute.xlu1 %635 }
 0x20a   : > { %v644_v58 = vpop.permute.xlu0 %643 }
 0x20b   : > { %v650_v45 = vsel %vm330_vm11, %v636_v57, %v644_v58  ;;  %v654_v46 = vsel %vm330_vm11, %v644_v58, %v636_v57 }
 0x20c   : > { %v604_v59 = vpop.permute.xlu1 %603 }
 0x20e   : > { %v612_v60 = vpop.permute.xlu0 %611 }
 0x210   : > { %v1867_v61 = vpop.permute.xlu1 %571 }
 0x212   : > { %v1869_v63 = vpop.permute.xlu0 %579 }
 0x213   : > { %v586_v41 = vsel %vm304_vm15, %v1867_v61, %v1869_v63 }
 0x214   : > { %v1871_v1 = vpop.permute.xlu1 %539 }
 0x216   : > { %v1873_v3 = vpop.permute.xlu0 %547 }
 0x218   : > { %v1875_v4 = vpop.permute.xlu1 %731 }
 0x21a   : > { %v1877_v5 = vpop.permute.xlu0 %739 }
 0x21c   : > { %v638_v6 = vpop.permute.xlu1 %637 }
 0x21e   : > { %v646_v7 = vpop.permute.xlu0 %645 }
 0x21f   : > { %v651_v39 = vsel %vm330_vm11, %v638_v6, %v646_v7  ;;  %v655_v40 = vsel %vm330_vm11, %v646_v7, %v638_v6  ;;  %v622_v6 = vsel %vm317_vm13, %v612_v60, %v604_v59 }
 0x220   : > { %v606_v12 = vpop.permute.xlu1 %605 }
 0x222   : > { %v614_v13 = vpop.permute.xlu0 %613 }
 0x223   : > { %v619_v57 = vsel %vm317_vm13, %v606_v12, %v614_v13 }
 0x224   : > { %v574_v15 = vpop.permute.xlu1 %573 }
 0x226   : > { %v582_v17 = vpop.permute.xlu0 %581 }
 0x228   : > { %v1879_v22 = vpop.permute.xlu1 %541 }
 0x22a   : > { %v1881_v23 = vpop.permute.xlu0 %549 }
 0x22c   : > { %v1883_v25 = vpop.permute.xlu1 %733 }
 0x22e   : > { %v1885_v26 = vpop.permute.xlu0 %741 }
 0x22f   : > { %v751_v19 = vsel %vm369_vm4, %v1885_v26, %v1883_v25  ;;  %v747_v50 = vsel %vm369_vm4, %v1883_v25, %v1885_v26 }
 0x230   : > { %v640_v30 = vpop.permute.xlu1 %639 }
 0x232   : > { %v648_v31 = vpop.permute.xlu0 %647 }
 0x233   : > { %v652_v32 = vsel %vm330_vm11, %v640_v30, %v648_v31  ;;  %v656_v35 = vsel %vm330_vm11, %v648_v31, %v640_v30  ;;  %v587_v30 = vsel %vm304_vm15, %v574_v15, %v582_v17 }
 0x234   : > { %1139 = vmatprep.subr.msk.mxu1 %vm1550_vm5, %v652_v32  ;;  %v1893_v36 = vpop.permute.xlu1 %701 }
 0x235   : > { %1140 = vmatpush1.msk.msra.mxu1 %vm1581_vm9, %v656_v35 }
 0x236   : > { %v1901_v43 = vpop.permute.xlu0 %709  ;;  %1141 = vmatprep.subr.msk.mxu1 %vm1550_vm5, %v651_v39 }
 0x237   : > { %1142 = vmatpush1.msk.msra.mxu1 %vm1581_vm9, %v655_v40  ;;  %v558_v40 = vsel %vm291_vm2, %v1873_v3, %v1871_v1 }
 0x238   : > { %1143 = vmatprep.subr.msk.mxu1 %vm1550_vm5, %v650_v45  ;;  %v608_v47 = vpop.permute.xlu1 %607 }
 0x239   : > { %1144 = vmatpush1.msk.msra.mxu1 %vm1581_vm9, %v654_v46 }
 0x23a   : > { %v616_v51 = vpop.permute.xlu0 %615  ;;  %1145 = vmatprep.subr.msk.mxu1 %vm1550_vm5, %v1807_v33  ;;  %v623_v33 = vsel %vm317_vm13, %v614_v13, %v606_v12 }
 0x23b   : > { %v620_v52 = vsel %vm317_vm13, %v608_v47, %v616_v51  ;;  %v624_v53 = vsel %vm317_vm13, %v616_v51, %v608_v47  ;;  %1146 = vmatpush1.msk.msra.mxu1 %vm1581_vm9, %v1811_v34  ;;  %v618_v34 = vsel %vm317_vm13, %v604_v59, %v612_v60  ;;  %v746_v47 = vsel %vm369_vm4, %v1875_v4, %v1877_v5 }
 0x23c   : > { %1147 = vmatprep.subr.msk.mxu1 %vm1535_vm1, %v620_v52  ;;  %v576_v54 = vpop.permute.xlu1 %575  ;;  %vm2269_vm13 = vcmp.lt.s32.totalorder %v1528_v9, 127 }
 0x23d   : > { %1148 = vmatpush1.msk.msra.mxu1 %vm1619_vm14, %v624_v53 }
 0x23e   : > { %v1933_v58 = vpop.permute.xlu0 %707  ;;  %1149 = vmatprep.subr.msk.mxu1 %vm1535_vm1, %v619_v57 }
 0x23f   : > { %1150 = vmatpush1.msk.msra.mxu1 %vm1619_vm14, %v623_v33 }
 0x240   : > { %1151 = vmatprep.subr.msk.mxu1 %vm1535_vm1, %v618_v34  ;;  %v544_v7 = vpop.permute.xlu1 %543 }
 0x241   : > { %1152 = vmatpush1.msk.msra.mxu1 %vm1619_vm14, %v622_v6 }
 0x242   : > { %v584_v12 = vpop.permute.xlu0 %583  ;;  %1153 = vmatprep.subr.msk.mxu1 %vm1535_vm1, %v1819_v37  ;;  %v591_v37 = vsel %vm304_vm15, %v582_v17, %v574_v15 }
 0x243   : > { %v592_v13 = vsel %vm304_vm15, %v584_v12, %v576_v54  ;;  %1154 = vmatpush1.msk.msra.mxu1 %vm1619_vm14, %v1823_v38  ;;  %v588_v59 = vsel %vm304_vm15, %v576_v54, %v584_v12  ;;  %v590_v38 = vsel %vm304_vm15, %v1869_v63, %v1867_v61  ;;  %v555_v63 = vsel %vm291_vm2, %v1879_v22, %v1881_v23  ;;  %vm2270_vm14 = vmmov %vm2269_vm13 }
 0x244   : > { %846 = vmatprep.subr.mxu1 %v588_v59  ;;  %v736_v60 = vpop.permute.xlu1 %735  ;;  %vm2271_vm15 = vmmov %vm2269_vm13 }
 0x245   : > { %1155 = vmatpush1.msk.msra.mxu1 %vm265_vm12, %v592_v13 }
 0x246   : > { %v1963_v31 = vpop.permute.xlu0 %705  ;;  %848 = vmatprep.subr.mxu1 %v587_v30 }
 0x247   : > { %1156 = vmatpush1.msk.msra.mxu1 %vm265_vm12, %v591_v37 }
 0x248   : > { %850 = vmatprep.subr.mxu1 %v586_v41  ;;  %v704_v32 = vpop.permute.xlu1 %703 }
 0x249   : > { %1157 = vmatpush1.msk.msra.mxu1 %vm265_vm12, %v590_v38 }
 0x24a   : > { %v552_v15 = vpop.permute.xlu0 %551  ;;  %852 = vmatprep.subr.mxu1 %v1838_v44  ;;  %v559_v44 = vsel %vm291_vm2, %v1881_v23, %v1879_v22 }
 0x24b   : > { %v556_v17 = vsel %vm291_vm2, %v544_v7, %v552_v15  ;;  %v560_v35 = vsel %vm291_vm2, %v552_v15, %v544_v7  ;;  %1158 = vmatpush1.msk.msra.mxu1 %vm265_vm12, %v1831_v42  ;;  %v554_v42 = vsel %vm291_vm2, %v1871_v1, %v1873_v3  ;;  %vm2261_vm2 = vcmp.lt.s32.totalorder %v1528_v9, 113 }
 0x24c   : > { %1159 = vmatprep.subr.msk.mxu1 %vm1550_vm5, %v556_v17  ;;  %v700_v61 = vpop.permute.xlu1 %699  ;;  %v529_v17 = vld [vmem:[#allocation2 + $0x20] sm:$0xff] }
 0x24d   : > { %1160 = vmatpush1.msk.msra.mxu1 %vm1643_vm10, %v560_v35  ;;  %v527_v35 = vld [vmem:[#allocation2 + $0x10] sm:$0xff] }
 0x24e   : > { %v678_v39 = vpop.permute.xlu0 %677  ;;  %1161 = vmatprep.subr.msk.mxu1 %vm1550_vm5, %v555_v63  ;;  %v536_v63 = vld [vmem:[#allocation2 + $0x58] sm:$0xff] }
 0x24f   : > { %1162 = vmatpush1.msk.msra.mxu1 %vm1643_vm10, %v559_v44 }
 0x250   : > { %1163 = vmatprep.subr.msk.mxu1 %vm1550_vm5, %v554_v42  ;;  %v698_v22 = vpop.permute.xlu1 %697 }
 0x251   : > { %1164 = vmatpush1.msk.msra.mxu1 %vm1643_vm10, %v558_v40 }
 0x252   : > { %v744_v23 = vpop.permute.xlu0 %743  ;;  %1165 = vmatprep.subr.msk.mxu1 %vm1550_vm5, %v1847_v48  ;;  %vm2262_vm5 = vmmov %vm2261_vm2 }
 0x253   : > { %v752_v45 = vsel %vm369_vm4, %v744_v23, %v736_v60  ;;  %1166 = vmatpush1.msk.msra.mxu1 %vm1643_vm10, %v1851_v49  ;;  %v748_v1 = vsel %vm369_vm4, %v736_v60, %v744_v23  ;;  %v750_v49 = vsel %vm369_vm4, %v1877_v5, %v1875_v4  ;;  %vm2263_vm4 = vmmov %vm2261_vm2 }
 0x254   : > { %1167 = vmatprep.subr.msk.mxu1 %vm268_vm0, %v752_v45  ;;  %v672_v3 = vpop.permute.xlu1 %671  ;;  %v719_v4 = vsel %vm2263_vm4, %v1901_v43, %v1893_v36 }
 0x255   : > { %863 = vmatpush2.msra.mxu1 %v748_v1 }
 0x256   : > { %v676_v48 = vpop.permute.xlu0 %675  ;;  %1168 = vmatprep.subr.msk.mxu1 %vm268_vm0, %v751_v19 }
 0x257   : > { %865 = vmatpush2.msra.mxu1 %v747_v50 }
 0x258   : > { %1169 = vmatprep.subr.msk.mxu1 %vm268_vm0, %v750_v49  ;;  %v670_v46 = vpop.permute.xlu1 %669 }
 0x259   : > { %867 = vmatpush2.msra.mxu1 %v746_v47  ;;  %v687_v34 = vsel %vm2271_vm15, %v678_v39, %v670_v46  ;;  %vm817_vm15 = vcmask 261120  }
 0x25a   : > { %v712_v51 = vpop.permute.xlu0 %711  ;;  %1170 = vmatprep.subr.msk.mxu1 %vm268_vm0, %v1861_v55  ;;  %vm2264_vm0 = vmmov %vm2261_vm2 }
 0x25b   : > { %v716_v25 = vsel %vm2261_vm2, %v704_v32, %v712_v51  ;;  %v720_v26 = vsel %vm2262_vm5, %v712_v51, %v704_v32  ;;  %869 = vmatpush2.msra.mxu1 %v1865_v56  ;;  %v715_v10 = vsel %vm2264_vm0, %v1893_v36, %v1901_v43  ;;  %vm2265_vm7 = vmmov %vm2264_vm0 }
 0x25c   : > { %1171 = vmatprep.subr.msk.mxu1 %vm1573_vm8, %v720_v26  ;;  %v668_v52 = vpop.permute.xlu1 %667  ;;  %v718_v56 = vsel %vm2265_vm7, %v1933_v58, %v700_v61  ;;  %vm2266_vm10 = vmmov %vm2264_vm0 }
 0x25d   : > { %1172 = vmatpush2.msk.msra.mxu1 %vm1581_vm9, %v716_v25  ;;  %v714_v5 = vsel %vm2266_vm10, %v700_v61, %v1933_v58  ;;  %vm2267_vm11 = vmmov %vm2264_vm0  ;;  %v534_v61 = vld [vmem:[#allocation2 + $0x48] sm:$0xff] }
 0x25e   : > { %v674_v55 = vpop.permute.xlu0 %673  ;;  %1173 = vmatprep.subr.msk.mxu1 %vm1573_vm8, %v719_v4  ;;  %v717_v36 = vsel %vm2267_vm11, %v1963_v31, %v698_v22  ;;  %vm2268_vm12 = vmmov %vm2264_vm0  ;;  %vm2277_vm0 = vcmp.lt.s32.totalorder %v1528_v9, 111  ;;  %v530_v9 = vld [vmem:[#allocation2 + $0x28] sm:$0xff] }
 0x25f   : > { %1174 = vmatpush2.msk.msra.mxu1 %vm1581_vm9, %v715_v10  ;;  %v713_v43 = vsel %vm2268_vm12, %v698_v22, %v1963_v31  ;;  %vm2278_vm7 = vmmov %vm2277_vm0 }
 0x260   : > { %1175 = vmatprep.subr.msk.mxu1 %vm1573_vm8, %v718_v56  ;;  %v666_v53 = vpop.permute.xlu1 %665  ;;  %vm2279_vm10 = vmmov %vm2277_vm0 }
 0x261   : > { %1176 = vmatpush2.msk.msra.mxu1 %vm1581_vm9, %v714_v5  ;;  %vm2281_vm11 = vmmov %vm2277_vm0 }
 0x262   : > { %v680_v54 = vpop.permute.xlu0 %679  ;;  %1177 = vmatprep.subr.msk.mxu1 %vm1573_vm8, %v717_v36  ;;  %vm2272_vm8 = vmmov %vm2269_vm13 }
 0x263   : > { %v684_v57 = vsel %vm2269_vm13, %v672_v3, %v680_v54  ;;  %v688_v33 = vsel %vm2270_vm14, %v680_v54, %v672_v3  ;;  %1178 = vmatpush2.msk.msra.mxu1 %vm1581_vm9, %v713_v43  ;;  %v683_v24 = vsel %vm2272_vm8, %v670_v46, %v678_v39  ;;  %vm2273_vm2 = vmmov %vm2272_vm8 }
 0x264   : > { %1179 = vmatprep.subr.msk.mxu1 %vm1535_vm1, %v688_v33  ;;  %v768_v58 = vpop.permute.xlu1 %767  ;;  %v686_v28 = vsel %vm2273_vm2, %v676_v48, %v668_v52  ;;  %vm2274_vm9 = vmmov %vm2273_vm2 }
 0x265   : > { %1180 = vmatpush2.msk.msra.mxu1 %vm1554_vm6, %v684_v57  ;;  %v682_v7 = vsel %vm2274_vm9, %v668_v52, %v676_v48  ;;  %vm2275_vm5 = vmmov %vm2273_vm2 }
 0x266   : > { %v774_v6 = vpop.permute.xlu0 %773  ;;  %1181 = vmatprep.subr.msk.mxu1 %vm1535_vm1, %v687_v34  ;;  %v685_v13 = vsel %vm2275_vm5, %v674_v55, %v666_v53  ;;  %vm2276_vm4 = vmmov %vm2273_vm2 }
 0x267   : > { %1182 = vmatpush2.msk.msra.mxu1 %vm1554_vm6, %v683_v24  ;;  %v681_v59 = vsel %vm2276_vm4, %v666_v53, %v674_v55  ;;  %vm2282_vm12 = vmmov %vm2277_vm0 }
 0x268   : > { %1183 = vmatprep.subr.msk.mxu1 %vm1535_vm1, %v686_v28  ;;  %v766_v12 = vpop.permute.xlu1 %765  ;;  %vm2283_vm13 = vmmov %vm2277_vm0 }
 0x269   : > { %1184 = vmatpush2.msk.msra.mxu1 %vm1554_vm6, %v682_v7  ;;  %v783_v41 = vsel %vm2279_vm10, %v774_v6, %v766_v12  ;;  %vm2284_vm14 = vmmov %vm2277_vm0 }
 0x26a   : > { %v776_v60 = vpop.permute.xlu0 %775  ;;  %1185 = vmatprep.subr.msk.mxu1 %vm1535_vm1, %v685_v13  ;;  %vm2280_vm1 = vmmov %vm2277_vm0 }
 0x26b   : > { %v780_v30 = vsel %vm2277_vm0, %v768_v58, %v776_v60  ;;  %v784_v37 = vsel %vm2278_vm7, %v776_v60, %v768_v58  ;;  %1186 = vmatpush2.msk.msra.mxu1 %vm1554_vm6, %v681_v59  ;;  %v779_v14 = vsel %vm2280_vm1, %v766_v12, %v774_v6 }
 0x26c   : > { %886 = vmatprep.subr.mxu1 %v1745_v29  ;;  %1187 = vmatprep.subr.msk.mxu0 %vm1545_vm3, %v784_v37  ;;  %v764_v31 = vpop.permute.xlu1 %763 }
 0x26d   : > { %887 = vmatpush2.msra.mxu1 %v1741_v27  ;;  %1188 = vmatpush1.msk.msra.mxu0 %vm1554_vm6, %v780_v30 }
 0x26e   : > { %v772_v38 = vpop.permute.xlu0 %771  ;;  %888 = vmatprep.subr.mxu1 %v1721_v21  ;;  %1189 = vmatprep.subr.msk.mxu0 %vm1545_vm3, %v783_v41  ;;  %v525_v21 = vld [vmem:[#allocation2] sm:$0xff] }
 0x26f   : > { %v778_v29 = vsel %vm2281_vm11, %v764_v31, %v772_v38  ;;  %v782_v32 = vsel %vm2282_vm12, %v772_v38, %v764_v31  ;;  %889 = vmatpush2.msra.mxu1 %v1717_v18  ;;  %1190 = vmatpush1.msk.msra.mxu0 %vm1554_vm6, %v779_v14 }
 0x270   : > { %890 = vmatprep.subr.mxu1 %v1697_v11  ;;  %1191 = vmatprep.subr.msk.mxu0 %vm1545_vm3, %v782_v32  ;;  %v762_v27 = vpop.permute.xlu1 %761 }
 0x271   : > { %891 = vmatpush2.msra.mxu1 %v1693_v8  ;;  %1192 = vmatpush1.msk.msra.mxu0 %vm1554_vm6, %v778_v29  ;;  %v532_v8 = vld [vmem:[#allocation2 + $0x38] sm:$0xff] }
 0x272   : > { %v770_v15 = vpop.permute.xlu0 %769  ;;  %892 = vmatprep.subr.mxu1 %v1673_v0  ;;  %v528_v0 = vld [vmem:[#allocation2 + $0x18] sm:$0xff] }
 0x273   : > { %v777_v18 = vsel %vm2283_vm13, %v762_v27, %v770_v15  ;;  %v781_v11 = vsel %vm2284_vm14, %v770_v15, %v762_v27  ;;  %893 = vmatpush2.msra.mxu1 %v1671_v62  ;;  %v531_v62 = vld [vmem:[#allocation2 + $0x30] sm:$0xff] }
 0x274   : > { %895 = vmatmul.mubr.f32.vlgmr.msra.gmra.mxu1 %v525_v21  ;;  %1193 = vmatprep.subr.msk.mxu0 %vm1545_vm3, %v781_v11 }
 0x275   : > { %1194 = vmatpush1.msk.msra.mxu0 %vm1554_vm6, %v777_v18  ;;  %900 = vmatprep.mubr.f32.mxu1 %v529_v17 }
 0x276   : > { %1195 = vmatmul.mubr.msk.f32.vlgmr.msra.gmra.mxu0 %vm817_vm15, %v527_v35 }
 0x277   : > { %989 = vmatprep.mubr.f32.mxu0 %v1371_v2 }
 0x278   : > { %901 = vmatmul.mubr.f32.gmra.mxu1 %v528_v0 }
 0x279   : > { %906 = vmatprep.mubr.f32.mxu1 %v532_v8 }
 0x27a   : > { %1196 = vmatmul.mubr.msk.f32.gmra.mxu0 %vm817_vm15, %v530_v9 }
 0x27b   : > { %995 = vmatprep.mubr.f32.mxu0 %v1371_v2 }
 0x27c   : > { %907 = vmatmul.mubr.f32.gmra.mxu1 %v531_v62 }
 0x27d   : > { %912 = vmatprep.mubr.f32.mxu1 %v535_v16  ;;  %v800_v44 = vpop.permute.xlu1 %799 }
 0x27e   : > { %1197 = vmatmul.mubr.msk.f32.gmra.mxu0 %vm817_vm15, %v533_v20 }
 0x27f   : > { %1001 = vmatprep.mubr.f32.mxu0 %v1371_v2  ;;  %v805_v23 = vpop.permute.xlu0 %804 }
 0x280   : > { %913 = vmatmul.mubr.f32.gmra.mxu1 %v534_v61 }
 0x281   : > { %v810_v47 = vpop.permute.xlu1 %809 }
 0x282   : > { %1198 = vmatmul.mubr.msk.f32.gmra.mxu0 %vm817_vm15, %v536_v63 }
 0x283   : > { %v815_v36 = vpop.permute.xlu0 %814 }
 0x334   : > { %v896_v39 = vpop.f32.mrf.mxu1 }
 0x335   : > { %v897_v42 = vadd.f32 %v896_v39, %v800_v44 }
 0x336   : > { %v898_v40 = vpop.f32.mrf.mxu1  ;;  %v985_v22 = vpop.f32.mrf.mxu0 }
 0x337   : > { %v899_v45 = vadd.f32 %v898_v40, %v800_v44  ;;  %v986_v1 = vadd.f32 %v985_v22, %v897_v42 }
 0x338   : > { %v902_v3 = vpop.f32.mrf.mxu1  ;;  %v987_v19 = vpop.f32.mrf.mxu0 }
 0x339   : > { %v1008_v48 = vmax.f32 %v986_v1, 0.0  ;;  %v903_v50 = vadd.f32 %v902_v3, %v805_v23  ;;  %v988_v2 = vadd.f32 %v987_v19, %v899_v45 }
 0x33a   : > { %v904_v49 = vpop.f32.mrf.mxu1  ;;  %v991_v46 = vpop.f32.mrf.mxu0 }
 0x33b   : > { %1016 = vst [vmem:[%s2171_s13] sm:$0xff] %v1008_v48  ;;  %v1009_v51 = vmax.f32 %v988_v2, 0.0  ;;  %v905_v25 = vadd.f32 %v904_v49, %v805_v23  ;;  %v992_v26 = vadd.f32 %v991_v46, %v903_v50 }
 0x33c   : > { %v908_v52 = vpop.f32.mrf.mxu1  ;;  %v993_v4 = vpop.f32.mrf.mxu0 }
 0x33d   : > { %1017 = vst [vmem:[%s2171_s13 + $0x8] sm:$0xff] %v1009_v51  ;;  %v1010_v10 = vmax.f32 %v992_v26, 0.0  ;;  %v909_v55 = vadd.f32 %v908_v52, %v810_v47  ;;  %v994_v56 = vadd.f32 %v993_v4, %v905_v25 }
 0x33e   : > { %v910_v5 = vpop.f32.mrf.mxu1  ;;  %v997_v53 = vpop.f32.mrf.mxu0 }
 0x33f   : > { %1018 = vst [vmem:[%s2171_s13 + $0x10] sm:$0xff] %v1010_v10  ;;  %v1011_v43 = vmax.f32 %v994_v56, 0.0  ;;  %v911_v54 = vadd.f32 %v910_v5, %v810_v47  ;;  %v998_v57 = vadd.f32 %v997_v53, %v909_v55 }
 0x340   : > { %v914_v33 = vpop.f32.mrf.mxu1  ;;  %v999_v58 = vpop.f32.mrf.mxu0 }
 0x341   : > { %1019 = vst [vmem:[%s2171_s13 + $0x18] sm:$0xff] %v1011_v43  ;;  %v1012_v34 = vmax.f32 %v998_v57, 0.0  ;;  %v915_v24 = vadd.f32 %v914_v33, %v815_v36  ;;  %v1000_v6 = vadd.f32 %v999_v58, %v911_v54 }
 0x342   : > { %v916_v28 = vpop.f32.mrf.mxu1  ;;  %v1003_v7 = vpop.f32.mrf.mxu0 }
 0x343   : > { %1020 = vst [vmem:[%s2171_s13 + $0x20] sm:$0xff] %v1012_v34  ;;  %v1013_v12 = vmax.f32 %v1000_v6, 0.0  ;;  %v917_v13 = vadd.f32 %v916_v28, %v815_v36  ;;  %v1004_v59 = vadd.f32 %v1003_v7, %v915_v24 }
 0x344   : > { %v1005_v60 = vpop.f32.mrf.mxu0 }
 0x345   : > { %1021 = vst [vmem:[%s2171_s13 + $0x28] sm:$0xff] %v1013_v12  ;;  %v1014_v30 = vmax.f32 %v1004_v59, 0.0  ;;  %v1006_v37 = vadd.f32 %v1005_v60, %v917_v13 }
 0x347   : > { %1022 = vst [vmem:[%s2171_s13 + $0x30] sm:$0xff] %v1014_v30  ;;  %v1015_v31 = vmax.f32 %v1006_v37, 0.0 }
 0x349   : > { %1023 = vst [vmem:[%s2171_s13 + $0x38] sm:$0xff] %v1015_v31 }
 0x34a   : > { %1310 = shalt.err (!%p1307_p0)
}
 0x34b   : > { %s1311_s9 = scalar_lea.hbm %s2187_s23, 1024  ;;  %s1315_s11 = scalar_lea.hbm %s2238_s5, 2048 }
 0x34c   : > { %p1312_p1 = scmp.ne.s32.totalorder %s2187_s23, %s1311_s9  ;;  %p1316_p4 = scmp.lt.s32.totalorder %s2187_s23, %s2238_s5 }
 0x34d   : > { %p1317_p7 = scmp.lt.s32.totalorder %s1315_s11, %s1311_s9 }
 0x34e   : > { %p1313_p2 = pnand %p1312_p1, %p1446_p5 }
 0x34f   : > { %p1318_p8 = por %p1317_p7, %p1316_p4 }
 0x350   : > { %p1314_p3 = pneg %p1313_p2 }
 0x352   : > { %p1319_p6 = pnand %p1318_p8, %p1314_p3 }
 0x354   : > { %1322 = shalt.err (!%p1319_p6)
}
 0x355   : > { %s1377_s15 = smov 256  }
 0x356   : > { %1210 = dma.vmem_to_hbm [thread:$0]  (%p1446_p5), %s2181_s14, 1024, %s2187_s23, %s2192_s26, %s1377_s15, %s1377_s15, %s1373_s8  }
 0x357 PF: > { %p1222_p9 = scmp.ge.s32.totalorder %s1361_s21, 2  ;;  %s1053_s16 = sand.u32 1, %s1349_s18  }
 0x358   : > { %p2285_p10 = scmp.ne.s32.totalorder %s2243_s29, 0  ;;  %s1054_s17 = scalar_lea.sflag [#allocation4], %s1053_s16 }
 0x35a   : > { %p1217_p11 = pnand %p1222_p9, %p2285_p10 }
 0x35c   : > { %p1218_p12 = pneg %p1217_p11 }
 0x35e   : > { %1344 = dma.done.wait (%p1218_p12), %s1054_s17, 1024  }
 0x35f   : > { %1346 = vsyncadd (%p1218_p12), %s1054_s17, 4294966272  ;;  %p16_p13 = scmp.ge.s32.totalorder %s1433_s24, 4   ;;  %s2286_s18 = smov %s1353_s19 }
 0x360   : > { %s2287_s19 = smov %s1357_s20  ;;  %s2288_s20 = smov %s1444_s27 }
 0x361   : > { %s2289_s21 = smov %s1433_s24  ;;  %18 = sbr.rel (!%p16_p13) target bundleno = 4 (0x4), region = 80 }
 0x366   :  { %1059 = vsyncpa [#allocation3], 1 }
 0x367   :  { %1061 = vsyncpa [#allocation3 + $0x1], 1 }
 0x368   :  { %1062 = vsyncpa [#allocation4], 1 }
 0x369   :  { %1064 = vsyncpa [#allocation4 + $0x1], 1 }

</bundles_post_ra>
